<compile_context>
chip_gen: v7x
topology: tpu7x:2x2x1
jax: 0.10.0
libtpu: 0.0.40
codegen_flags: <defaults>
</compile_context>

<pallas_src>
import functools

import jax
import jax.numpy as jnp
from jax.experimental import pallas as pl
from jax.experimental.pallas import tpu as pltpu


def _conv_row_kernel(ee_ref, eo_ref, een_ref, eon_ref, oe_ref, oo_ref,
                     w_ref, b_ref, o_ref):
    """One output row of the stride-2 3x3 conv.

    Block shapes:
      ee/een/oe : (1, 1, Wo+1, Cin)  even-column phases (+1 col for kw=2)
      eo/eon/oo : (1, 1, Wo,   Cin)  odd-column phases
      w         : (9, Cin, Coutp)    tap-major (kh*3+kw) weights, VMEM-resident
      b         : (1, Coutp)         f32 bias, VMEM-resident
      o         : (1, 1, Wo, Coutp)
    """
    wo = o_ref.shape[2]
    ee, eo = ee_ref[0, 0], eo_ref[0, 0]        # kh = 0 (even input row 2*oh)
    oe, oo = oe_ref[0, 0], oo_ref[0, 0]        # kh = 1 (odd  input row 2*oh+1)
    een, eon = een_ref[0, 0], eon_ref[0, 0]    # kh = 2 (even input row 2*oh+2)
    taps = (ee[:wo], eo, ee[1:],               # kw = 0, 1, 2
            oe[:wo], oo, oe[1:],
            een[:wo], eon, een[1:])
    acc = jnp.zeros((wo, o_ref.shape[3]), jnp.float32)
    for k, tap in enumerate(taps):             # unrolled: 9 accumulating MXU matmuls
        acc += jnp.dot(tap, w_ref[k], preferred_element_type=jnp.float32)
    o_ref[0, 0] = (acc + b_ref[...]).astype(o_ref.dtype)   # f32 epilogue, one cast


@functools.partial(jax.jit, static_argnames=("compute_dtype",))
def downsample_forward(x_nchw, weight, bias, *, compute_dtype=jnp.bfloat16):
    """Downsample.forward (with_conv=True).

    x_nchw : (N, Cin, H, W)
    weight : (Cout, Cin, 3, 3)   PyTorch Conv2d layout
    bias   : (Cout,)
    returns (N, Cout, Ho, Wo)
    """
    N, C, H, W = x_nchw.shape
    Cout = weight.shape[0]
    Coutp = -(-Cout // 128) * 128              # lane-dense output channels

    # F.pad(x, (0, 1, 0, 1)) then 3x3 stride-2 VALID conv.
    x = jnp.transpose(x_nchw, (0, 2, 3, 1))    # NHWC
    x = jnp.pad(x, ((0, 0), (0, 1), (0, 1), (0, 0)))
    Hp, Wp = H + 1, W + 1
    Ho, Wo = (Hp - 3) // 2 + 1, (Wp - 3) // 2 + 1

    # Stride-2 phase split: pure re-partition of the padded input (~1x bytes,
    # replaces the 9x im2col).  bf16 cast here also halves kernel HBM reads.
    xc = x.astype(compute_dtype)
    xe = xc[:, 0:2 * Ho + 1:2]                 # even rows (N, Ho+1, Wp, C)
    xo = xc[:, 1:2 * Ho:2]                     # odd rows  (N, Ho,   Wp, C)
    x_ee = xe[:, :, 0:2 * Wo + 1:2]            # (N, Ho+1, Wo+1, C)
    x_eo = xe[:, :, 1:2 * Wo:2]                # (N, Ho+1, Wo,   C)
    x_oe = xo[:, :, 0:2 * Wo + 1:2]            # (N, Ho,   Wo+1, C)
    x_oo = xo[:, :, 1:2 * Wo:2]                # (N, Ho,   Wo,   C)

    # weight (Cout, Cin, kh, kw) -> (kh*3+kw, Cin, Coutp), zero-padded channels.
    w_t = jnp.transpose(weight, (2, 3, 1, 0)).reshape(9, C, Cout)
    w_p = jnp.pad(w_t, ((0, 0), (0, 0), (0, Coutp - Cout))).astype(compute_dtype)
    b_p = jnp.pad(bias, (0, Coutp - Cout)).astype(jnp.float32).reshape(1, Coutp)

    spec_e0 = pl.BlockSpec((1, 1, Wo + 1, C), lambda n, r: (n, r, 0, 0))
    spec_o0 = pl.BlockSpec((1, 1, Wo, C), lambda n, r: (n, r, 0, 0))
    spec_e1 = pl.BlockSpec((1, 1, Wo + 1, C), lambda n, r: (n, r + 1, 0, 0))
    spec_o1 = pl.BlockSpec((1, 1, Wo, C), lambda n, r: (n, r + 1, 0, 0))

    in_itm = jnp.dtype(compute_dtype).itemsize
    out_itm = x_nchw.dtype.itemsize
    bytes_accessed = (in_itm * (2 * x_ee.size + 2 * x_eo.size + x_oe.size
                                + x_oo.size + w_p.size)
                      + 4 * b_p.size + out_itm * N * Ho * Wo * Coutp)
    flops = 2 * N * Ho * Wo * 9 * C * Coutp

    out_nhwc = pl.pallas_call(
        _conv_row_kernel,
        out_shape=jax.ShapeDtypeStruct((N, Ho, Wo, Coutp), x_nchw.dtype),
        grid=(N, Ho),
        in_specs=[
            spec_e0,                                                 # x_ee row oh   (kh=0)
            spec_o0,                                                 # x_eo row oh   (kh=0)
            spec_e1,                                                 # x_ee row oh+1 (kh=2)
            spec_o1,                                                 # x_eo row oh+1 (kh=2)
            spec_e0,                                                 # x_oe row oh   (kh=1)
            spec_o0,                                                 # x_oo row oh   (kh=1)
            pl.BlockSpec((9, C, Coutp), lambda n, r: (0, 0, 0)),     # weights (resident)
            pl.BlockSpec((1, Coutp), lambda n, r: (0, 0)),           # bias    (resident)
        ],
        out_specs=pl.BlockSpec((1, 1, Wo, Coutp), lambda n, r: (n, r, 0, 0)),
        compiler_params=pltpu.CompilerParams(
            dimension_semantics=("parallel", "parallel"),
            vmem_limit_bytes=48 * 1024 * 1024,        # headroom within v7x's 64 MiB
        ),
        cost_estimate=pl.CostEstimate(flops=flops, transcendentals=0,
                                      bytes_accessed=bytes_accessed),
    )(x_ee, x_eo, x_ee, x_eo, x_oe, x_oo, w_p, b_p)

    out = out_nhwc[..., :Cout]                 # drop lane padding
    return jnp.transpose(out, (0, 3, 1, 2))    # back to NCHW


if __name__ == "__main__":
    key = jax.random.PRNGKey(0)
    k_x, k_w, k_b = jax.random.split(key, 3)

    N, C, H, W = 2, 4, 16, 16
    x = jax.random.normal(k_x, (N, C, H, W), dtype=jnp.float32)

    # Deterministic params; Conv2d(C, C, kernel_size=3) shapes.
    fan_in = C * 3 * 3
    bound = 1.0 / (fan_in ** 0.5)
    weight = jax.random.uniform(k_w, (C, C, 3, 3), minval=-bound, maxval=bound,
                                dtype=jnp.float32)
    bias = jax.random.uniform(k_b, (C,), minval=-bound, maxval=bound,
                              dtype=jnp.float32)

    # Pure-JAX reference: F.pad(0,1,0,1) + Conv2d(stride=2, padding=0).
    def conv_ref(x_in, w_in):
        x_pad = jnp.pad(x_in, ((0, 0), (0, 0), (0, 1), (0, 1)))
        y = jax.lax.conv_general_dilated(
            x_pad, w_in, window_strides=(2, 2), padding="VALID",
            dimension_numbers=("NCHW", "OIHW", "NCHW"))
        return y + bias.reshape(1, C, 1, 1)

    # 1) Exact-semantics check with f32 MXU operands.
    out_f32 = jax.block_until_ready(
        downsample_forward(x, weight, bias, compute_dtype=jnp.float32))
    assert out_f32.shape == (N, C, 8, 8), out_f32.shape
    assert jnp.allclose(out_f32, conv_ref(x, weight), atol=1e-4, rtol=1e-4)

    # 2) Fast path (bf16 MXU operands, f32 accumulation): compare against a
    #    reference with the same bf16 input rounding applied.
    out_bf16 = jax.block_until_ready(
        downsample_forward(x, weight, bias, compute_dtype=jnp.bfloat16))
    ref_q = conv_ref(x.astype(jnp.bfloat16).astype(jnp.float32),
                     weight.astype(jnp.bfloat16).astype(jnp.float32))
    assert out_bf16.shape == (N, C, 8, 8), out_bf16.shape
    assert jnp.allclose(out_bf16, ref_q, atol=1e-3, rtol=1e-3)

    print("KERNEL_OK")
</pallas_src>

<mosaic_0001>
module attributes {stable_mosaic.version = 11 : i64} {
  func.func @_conv_row_kernel(%arg0: i32, %arg1: i32, %arg2: memref<1x1x9x4xf32, #tpu.memory_space<vmem>>, %arg3: memref<1x1x8x4xf32, #tpu.memory_space<vmem>>, %arg4: memref<1x1x9x4xf32, #tpu.memory_space<vmem>>, %arg5: memref<1x1x8x4xf32, #tpu.memory_space<vmem>>, %arg6: memref<1x1x9x4xf32, #tpu.memory_space<vmem>>, %arg7: memref<1x1x8x4xf32, #tpu.memory_space<vmem>>, %arg8: memref<9x4x128xf32, #tpu.memory_space<vmem>>, %arg9: memref<1x128xf32, #tpu.memory_space<vmem>>, %arg10: memref<1x1x8x128xf32, #tpu.memory_space<vmem>>) attributes {dimension_semantics = [#tpu.dimension_semantics<parallel>, #tpu.dimension_semantics<parallel>], iteration_bounds = array<i64: 2, 8>, scalar_prefetch = 0 : i64, scratch_operands = 0 : i64, tpu.core_type = #tpu.core_type<tc>, window_params = [{transform_indices = @transform_0, window_bounds = array<i64: 1, 1, 9, 4>}, {transform_indices = @transform_1, window_bounds = array<i64: 1, 1, 8, 4>}, {transform_indices = @transform_2, window_bounds = array<i64: 1, 1, 9, 4>}, {transform_indices = @transform_3, window_bounds = array<i64: 1, 1, 8, 4>}, {transform_indices = @transform_4, window_bounds = array<i64: 1, 1, 9, 4>}, {transform_indices = @transform_5, window_bounds = array<i64: 1, 1, 8, 4>}, {pipeline_mode = #tpu.pipeline_mode<synchronous>, transform_indices = @transform_6, window_bounds = array<i64: 9, 4, 128>}, {pipeline_mode = #tpu.pipeline_mode<synchronous>, transform_indices = @transform_7, window_bounds = array<i64: 1, 128>}, {transform_indices = @transform_8, window_bounds = array<i64: 1, 1, 8, 128>}]} {
    %c0 = arith.constant 0 : index
    %c0_0 = arith.constant 0 : index
    %c0_1 = arith.constant 0 : index
    %c0_2 = arith.constant 0 : index
    %0 = vector.load %arg2[%c0, %c0_0, %c0_1, %c0_2] : memref<1x1x9x4xf32, #tpu.memory_space<vmem>>, vector<1x1x9x4xf32>
    %1 = vector.shape_cast %0 : vector<1x1x9x4xf32> to vector<9x4xf32>
    %c0_3 = arith.constant 0 : index
    %c0_4 = arith.constant 0 : index
    %c0_5 = arith.constant 0 : index
    %c0_6 = arith.constant 0 : index
    %2 = vector.load %arg3[%c0_3, %c0_4, %c0_5, %c0_6] : memref<1x1x8x4xf32, #tpu.memory_space<vmem>>, vector<1x1x8x4xf32>
    %3 = vector.shape_cast %2 : vector<1x1x8x4xf32> to vector<8x4xf32>
    %c0_7 = arith.constant 0 : index
    %c0_8 = arith.constant 0 : index
    %c0_9 = arith.constant 0 : index
    %c0_10 = arith.constant 0 : index
    %4 = vector.load %arg6[%c0_7, %c0_8, %c0_9, %c0_10] : memref<1x1x9x4xf32, #tpu.memory_space<vmem>>, vector<1x1x9x4xf32>
    %5 = vector.shape_cast %4 : vector<1x1x9x4xf32> to vector<9x4xf32>
    %c0_11 = arith.constant 0 : index
    %c0_12 = arith.constant 0 : index
    %c0_13 = arith.constant 0 : index
    %c0_14 = arith.constant 0 : index
    %6 = vector.load %arg7[%c0_11, %c0_12, %c0_13, %c0_14] : memref<1x1x8x4xf32, #tpu.memory_space<vmem>>, vector<1x1x8x4xf32>
    %7 = vector.shape_cast %6 : vector<1x1x8x4xf32> to vector<8x4xf32>
    %c0_15 = arith.constant 0 : index
    %c0_16 = arith.constant 0 : index
    %c0_17 = arith.constant 0 : index
    %c0_18 = arith.constant 0 : index
    %8 = vector.load %arg4[%c0_15, %c0_16, %c0_17, %c0_18] : memref<1x1x9x4xf32, #tpu.memory_space<vmem>>, vector<1x1x9x4xf32>
    %9 = vector.shape_cast %8 : vector<1x1x9x4xf32> to vector<9x4xf32>
    %c0_19 = arith.constant 0 : index
    %c0_20 = arith.constant 0 : index
    %c0_21 = arith.constant 0 : index
    %c0_22 = arith.constant 0 : index
    %10 = vector.load %arg5[%c0_19, %c0_20, %c0_21, %c0_22] : memref<1x1x8x4xf32, #tpu.memory_space<vmem>>, vector<1x1x8x4xf32>
    %11 = vector.shape_cast %10 : vector<1x1x8x4xf32> to vector<8x4xf32>
    %12 = vector.extract_strided_slice %1 {offsets = [0, 0], sizes = [8, 4], strides = [1, 1]} : vector<9x4xf32> to vector<8x4xf32>
    %13 = vector.extract_strided_slice %1 {offsets = [1, 0], sizes = [8, 4], strides = [1, 1]} : vector<9x4xf32> to vector<8x4xf32>
    %14 = vector.extract_strided_slice %5 {offsets = [0, 0], sizes = [8, 4], strides = [1, 1]} : vector<9x4xf32> to vector<8x4xf32>
    %15 = vector.extract_strided_slice %5 {offsets = [1, 0], sizes = [8, 4], strides = [1, 1]} : vector<9x4xf32> to vector<8x4xf32>
    %16 = vector.extract_strided_slice %9 {offsets = [0, 0], sizes = [8, 4], strides = [1, 1]} : vector<9x4xf32> to vector<8x4xf32>
    %17 = vector.extract_strided_slice %9 {offsets = [1, 0], sizes = [8, 4], strides = [1, 1]} : vector<9x4xf32> to vector<8x4xf32>
    %cst = arith.constant 0.000000e+00 : f32
    %18 = vector.broadcast %cst : f32 to vector<8x128xf32>
    %c0_23 = arith.constant 0 : index
    %c0_24 = arith.constant 0 : index
    %c0_25 = arith.constant 0 : index
    %19 = vector.load %arg8[%c0_23, %c0_24, %c0_25] : memref<9x4x128xf32, #tpu.memory_space<vmem>>, vector<1x4x128xf32>
    %20 = vector.shape_cast %19 : vector<1x4x128xf32> to vector<4x128xf32>
    %cst_26 = arith.constant dense<0.000000e+00> : vector<8x128xf32>
    %21 = tpu.matmul %12, %20, %cst_26 {dimension_numbers = #tpu.dot_dimension_numbers<[1], [0], [0], [1], [0, 0, 1, 1], [], []>} : vector<8x4xf32>, vector<4x128xf32>, vector<8x128xf32> -> vector<8x128xf32>
    %22 = arith.addf %18, %21 : vector<8x128xf32>
    %c1 = arith.constant 1 : index
    %c0_27 = arith.constant 0 : index
    %c0_28 = arith.constant 0 : index
    %23 = vector.load %arg8[%c1, %c0_27, %c0_28] : memref<9x4x128xf32, #tpu.memory_space<vmem>>, vector<1x4x128xf32>
    %24 = vector.shape_cast %23 : vector<1x4x128xf32> to vector<4x128xf32>
    %cst_29 = arith.constant dense<0.000000e+00> : vector<8x128xf32>
    %25 = tpu.matmul %3, %24, %cst_29 {dimension_numbers = #tpu.dot_dimension_numbers<[1], [0], [0], [1], [0, 0, 1, 1], [], []>} : vector<8x4xf32>, vector<4x128xf32>, vector<8x128xf32> -> vector<8x128xf32>
    %26 = arith.addf %22, %25 : vector<8x128xf32>
    %c2 = arith.constant 2 : index
    %c0_30 = arith.constant 0 : index
    %c0_31 = arith.constant 0 : index
    %27 = vector.load %arg8[%c2, %c0_30, %c0_31] : memref<9x4x128xf32, #tpu.memory_space<vmem>>, vector<1x4x128xf32>
    %28 = vector.shape_cast %27 : vector<1x4x128xf32> to vector<4x128xf32>
    %cst_32 = arith.constant dense<0.000000e+00> : vector<8x128xf32>
    %29 = tpu.matmul %13, %28, %cst_32 {dimension_numbers = #tpu.dot_dimension_numbers<[1], [0], [0], [1], [0, 0, 1, 1], [], []>} : vector<8x4xf32>, vector<4x128xf32>, vector<8x128xf32> -> vector<8x128xf32>
    %30 = arith.addf %26, %29 : vector<8x128xf32>
    %c3 = arith.constant 3 : index
    %c0_33 = arith.constant 0 : index
    %c0_34 = arith.constant 0 : index
    %31 = vector.load %arg8[%c3, %c0_33, %c0_34] : memref<9x4x128xf32, #tpu.memory_space<vmem>>, vector<1x4x128xf32>
    %32 = vector.shape_cast %31 : vector<1x4x128xf32> to vector<4x128xf32>
    %cst_35 = arith.constant dense<0.000000e+00> : vector<8x128xf32>
    %33 = tpu.matmul %14, %32, %cst_35 {dimension_numbers = #tpu.dot_dimension_numbers<[1], [0], [0], [1], [0, 0, 1, 1], [], []>} : vector<8x4xf32>, vector<4x128xf32>, vector<8x128xf32> -> vector<8x128xf32>
    %34 = arith.addf %30, %33 : vector<8x128xf32>
    %c4 = arith.constant 4 : index
    %c0_36 = arith.constant 0 : index
    %c0_37 = arith.constant 0 : index
    %35 = vector.load %arg8[%c4, %c0_36, %c0_37] : memref<9x4x128xf32, #tpu.memory_space<vmem>>, vector<1x4x128xf32>
    %36 = vector.shape_cast %35 : vector<1x4x128xf32> to vector<4x128xf32>
    %cst_38 = arith.constant dense<0.000000e+00> : vector<8x128xf32>
    %37 = tpu.matmul %7, %36, %cst_38 {dimension_numbers = #tpu.dot_dimension_numbers<[1], [0], [0], [1], [0, 0, 1, 1], [], []>} : vector<8x4xf32>, vector<4x128xf32>, vector<8x128xf32> -> vector<8x128xf32>
    %38 = arith.addf %34, %37 : vector<8x128xf32>
    %c5 = arith.constant 5 : index
    %c0_39 = arith.constant 0 : index
    %c0_40 = arith.constant 0 : index
    %39 = vector.load %arg8[%c5, %c0_39, %c0_40] : memref<9x4x128xf32, #tpu.memory_space<vmem>>, vector<1x4x128xf32>
    %40 = vector.shape_cast %39 : vector<1x4x128xf32> to vector<4x128xf32>
    %cst_41 = arith.constant dense<0.000000e+00> : vector<8x128xf32>
    %41 = tpu.matmul %15, %40, %cst_41 {dimension_numbers = #tpu.dot_dimension_numbers<[1], [0], [0], [1], [0, 0, 1, 1], [], []>} : vector<8x4xf32>, vector<4x128xf32>, vector<8x128xf32> -> vector<8x128xf32>
    %42 = arith.addf %38, %41 : vector<8x128xf32>
    %c6 = arith.constant 6 : index
    %c0_42 = arith.constant 0 : index
    %c0_43 = arith.constant 0 : index
    %43 = vector.load %arg8[%c6, %c0_42, %c0_43] : memref<9x4x128xf32, #tpu.memory_space<vmem>>, vector<1x4x128xf32>
    %44 = vector.shape_cast %43 : vector<1x4x128xf32> to vector<4x128xf32>
    %cst_44 = arith.constant dense<0.000000e+00> : vector<8x128xf32>
    %45 = tpu.matmul %16, %44, %cst_44 {dimension_numbers = #tpu.dot_dimension_numbers<[1], [0], [0], [1], [0, 0, 1, 1], [], []>} : vector<8x4xf32>, vector<4x128xf32>, vector<8x128xf32> -> vector<8x128xf32>
    %46 = arith.addf %42, %45 : vector<8x128xf32>
    %c7 = arith.constant 7 : index
    %c0_45 = arith.constant 0 : index
    %c0_46 = arith.constant 0 : index
    %47 = vector.load %arg8[%c7, %c0_45, %c0_46] : memref<9x4x128xf32, #tpu.memory_space<vmem>>, vector<1x4x128xf32>
    %48 = vector.shape_cast %47 : vector<1x4x128xf32> to vector<4x128xf32>
    %cst_47 = arith.constant dense<0.000000e+00> : vector<8x128xf32>
    %49 = tpu.matmul %11, %48, %cst_47 {dimension_numbers = #tpu.dot_dimension_numbers<[1], [0], [0], [1], [0, 0, 1, 1], [], []>} : vector<8x4xf32>, vector<4x128xf32>, vector<8x128xf32> -> vector<8x128xf32>
    %50 = arith.addf %46, %49 : vector<8x128xf32>
    %c8 = arith.constant 8 : index
    %c0_48 = arith.constant 0 : index
    %c0_49 = arith.constant 0 : index
    %51 = vector.load %arg8[%c8, %c0_48, %c0_49] : memref<9x4x128xf32, #tpu.memory_space<vmem>>, vector<1x4x128xf32>
    %52 = vector.shape_cast %51 : vector<1x4x128xf32> to vector<4x128xf32>
    %cst_50 = arith.constant dense<0.000000e+00> : vector<8x128xf32>
    %53 = tpu.matmul %17, %52, %cst_50 {dimension_numbers = #tpu.dot_dimension_numbers<[1], [0], [0], [1], [0, 0, 1, 1], [], []>} : vector<8x4xf32>, vector<4x128xf32>, vector<8x128xf32> -> vector<8x128xf32>
    %54 = arith.addf %50, %53 : vector<8x128xf32>
    %c0_51 = arith.constant 0 : index
    %c0_52 = arith.constant 0 : index
    %55 = vector.load %arg9[%c0_51, %c0_52] : memref<1x128xf32, #tpu.memory_space<vmem>>, vector<1x128xf32>
    %56 = vector.broadcast %55 : vector<1x128xf32> to vector<8x128xf32>
    %57 = arith.addf %54, %56 : vector<8x128xf32>
    %c0_53 = arith.constant 0 : index
    %c0_54 = arith.constant 0 : index
    %c0_55 = arith.constant 0 : index
    %c0_56 = arith.constant 0 : index
    %58 = vector.load %arg10[%c0_53, %c0_54, %c0_55, %c0_56] : memref<1x1x8x128xf32, #tpu.memory_space<vmem>>, vector<1x1x8x128xf32>
    %59 = vector.shape_cast %58 : vector<1x1x8x128xf32> to vector<8x128xf32>
    %60 = vector.shape_cast %57 : vector<8x128xf32> to vector<1x1x8x128xf32>
    tpu.vector_store %arg10[%c0_53, %c0_54, %c0_55, %c0_56], %60 {strides = array<i32>} : memref<1x1x8x128xf32, #tpu.memory_space<vmem>>, vector<1x1x8x128xf32>,
    return
  }
  func.func @transform_0(%arg0: i32, %arg1: i32) -> (i32, i32, i32, i32) {
    %c0_i32 = arith.constant 0 : i32
    %c0_i32_0 = arith.constant 0 : i32
    %c0_i32_1 = arith.constant 0 : i32
    return %arg0, %arg1, %c0_i32, %c0_i32_0 : i32, i32, i32, i32
  }
  func.func @transform_1(%arg0: i32, %arg1: i32) -> (i32, i32, i32, i32) {
    %c0_i32 = arith.constant 0 : i32
    %c0_i32_0 = arith.constant 0 : i32
    %c0_i32_1 = arith.constant 0 : i32
    return %arg0, %arg1, %c0_i32, %c0_i32_0 : i32, i32, i32, i32
  }
  func.func @transform_2(%arg0: i32, %arg1: i32) -> (i32, i32, i32, i32) {
    %c1_i32 = arith.constant 1 : i32
    %0 = arith.addi %arg1, %c1_i32 : i32
    %c0_i32 = arith.constant 0 : i32
    %c0_i32_0 = arith.constant 0 : i32
    %c0_i32_1 = arith.constant 0 : i32
    return %arg0, %0, %c0_i32, %c0_i32_0 : i32, i32, i32, i32
  }
  func.func @transform_3(%arg0: i32, %arg1: i32) -> (i32, i32, i32, i32) {
    %c1_i32 = arith.constant 1 : i32
    %0 = arith.addi %arg1, %c1_i32 : i32
    %c0_i32 = arith.constant 0 : i32
    %c0_i32_0 = arith.constant 0 : i32
    %c0_i32_1 = arith.constant 0 : i32
    return %arg0, %0, %c0_i32, %c0_i32_0 : i32, i32, i32, i32
  }
  func.func @transform_4(%arg0: i32, %arg1: i32) -> (i32, i32, i32, i32) {
    %c0_i32 = arith.constant 0 : i32
    %c0_i32_0 = arith.constant 0 : i32
    %c0_i32_1 = arith.constant 0 : i32
    return %arg0, %arg1, %c0_i32, %c0_i32_0 : i32, i32, i32, i32
  }
  func.func @transform_5(%arg0: i32, %arg1: i32) -> (i32, i32, i32, i32) {
    %c0_i32 = arith.constant 0 : i32
    %c0_i32_0 = arith.constant 0 : i32
    %c0_i32_1 = arith.constant 0 : i32
    return %arg0, %arg1, %c0_i32, %c0_i32_0 : i32, i32, i32, i32
  }
  func.func @transform_6(%arg0: i32, %arg1: i32) -> (i32, i32, i32) {
    %c0_i32 = arith.constant 0 : i32
    %c0_i32_0 = arith.constant 0 : i32
    %c0_i32_1 = arith.constant 0 : i32
    %c0_i32_2 = arith.constant 0 : i32
    return %c0_i32, %c0_i32_0, %c0_i32_1 : i32, i32, i32
  }
  func.func @transform_7(%arg0: i32, %arg1: i32) -> (i32, i32) {
    %c0_i32 = arith.constant 0 : i32
    %c0_i32_0 = arith.constant 0 : i32
    %c0_i32_1 = arith.constant 0 : i32
    return %c0_i32, %c0_i32_0 : i32, i32
  }
  func.func @transform_8(%arg0: i32, %arg1: i32) -> (i32, i32, i32, i32) {
    %c0_i32 = arith.constant 0 : i32
    %c0_i32_0 = arith.constant 0 : i32
    %c0_i32_1 = arith.constant 0 : i32
    return %arg0, %arg1, %c0_i32, %c0_i32_0 : i32, i32, i32, i32
  }
}

</mosaic_0001>

<bundles_post_ra>
// kernel: downsample_forward.1
= control target key start
LH: loop header
LB: loop body
LE: loop exit
PB: predicated region body
PF: predicated region fallthrough
CT: control target
= control target key end

     0   :  { %s1679_s27 = smov 0   ;;  %s1681_s28 = smov 0   ;;  %s1855_s0 = inlined_call_operand.vmem [shape: f32[2,9,9,4], index: 0, kind: input, shape index: {}, may-alias: {0,2}]   ;;  %s1856_s1 = inlined_call_operand.vmem [shape: f32[2,9,8,4], index: 1, kind: input, shape index: {}, may-alias: {1,3}]   ;;  %s1857_s2 = inlined_call_operand.vmem [shape: f32[2,9,9,4], index: 2, kind: input, shape index: {}, may-alias: {0,2}]   ;;  %s1858_s3 = inlined_call_operand.vmem [shape: f32[2,9,8,4], index: 3, kind: input, shape index: {}, may-alias: {1,3}]   ;;  %s1859_s4 = inlined_call_operand.vmem [shape: f32[2,8,9,4], index: 4, kind: input, shape index: {}]   ;;  %s1860_s5 = inlined_call_operand.vmem [shape: f32[2,8,8,4], index: 5, kind: input, shape index: {}]   ;;  %s1861_s6 = inlined_call_operand.vmem [shape: f32[9,4,128], index: 6, kind: input, shape index: {}]   ;;  %s1862_s7 = inlined_call_operand.vmem [shape: f32[1,128], index: 7, kind: input, shape index: {}]   ;;  %s1863_s8 = inlined_call_operand.vmem [shape: f32[2,8,8,128], index: 8, kind: output, shape index: {}]  }
   0x1   :  { %s1683_s29 = smov 0   ;;  %s1685_s30 = smov 0  }
   0x2   :  { %s1687_s9 = smov 0  }
   0x3 LB: > { %s27_s10 = sadd.s32 1, %s1622_s29  ;;  %s30_s11 = sadd.s32 1, %s1626_s30  ;;  %s1630_s9 = sphi %s1687_s9, %s18_s9   ;;  %s1626_s30 = sphi %s1685_s30, %s1870_s30   ;;  %s1622_s29 = sphi %s1683_s29, %s1869_s29   ;;  %s1618_s28 = sphi %s1681_s28, %s1868_s28   ;;  %s1614_s27 = sphi %s1679_s27, %s1867_s27  }
   0x4   : > { %p28_p0 = scmp.ge.s32.totalorder %s27_s10, 8  ;;  %p1442_p1 = scmp.ge.s32.totalorder %s1630_s9, 1 }
   0x5   : > { %p367_p2 = scmp.lt.s32.totalorder %s1630_s9, 17 }
   0x6   : > { %s1872_s10 = smov (%p28_p0, %s27_s10), 0  ;;  %s1874_s11 = smov (!%p28_p0, %s30_s11), %s1626_s30 }
   0x7   : > { %p368_p3 = pnand %p1442_p1, %p367_p2  ;;  %p32_p4 = scmp.ge.s32.totalorder %s1874_s11, 2 }
   0x8   : > { %v1456_v0 = vld [vmem:[%s1861_s6 + $0x4] sm:$0xf] (!%p368_p3)  ;;  %vm531_vm0 = vcmask (!%p368_p3), 1043456   ;;  %p452_p5 = scmp.lt.s32.totalorder (!%p368_p3), %s1618_s28, 1  ;;  %v1632_v1 = vmov (!%p368_p3), 0.0   ;;  %p454_p6 = scmp.lt.s32.totalorder (!%p368_p3), %s1614_s27, 8 }
   0x9   : > { %s1876_s11 = smov (%p32_p4, %s1874_s11), 0  ;;  %371 = sbr.rel (%p368_p3) target bundleno = 258 (0x102), region = 52 }
   0xa   : > { %1503 = vmatprep.subr.mxu0 (!%p368_p3), %v1632_v1  ;;  %1508 = vmatprep.subr.mxu1 (!%p368_p3), %v1632_v1  ;;  %v524_v2 = vld [vmem:[%s1861_s6] sm:$0xf] (!%p368_p3)  ;;  %vm1633_vm1 = vmmov (!%p368_p3), 0   ;;  %p492_p7 = scmp.lt.s32.totalorder (!%p368_p3), %s1614_s27, 7  ;;  %vm527_vm2 = vcmask (!%p368_p3), 31744   ;;  %vm684_vm3 = vcmask (!%p368_p3), 1046528  }
   0xb   : > { %1504 = vmatpush3.msk.msra.mxu0 (!%p368_p3), %vm531_vm0, %v1456_v0  ;;  %1505 = vmatprep.mubr.msk.f32.mxu0 (!%p368_p3), %vm1633_vm1, %v1632_v1  ;;  %v1461_v3 = vld [vmem:[%s1861_s6 + $0x8] sm:$0xf] (!%p368_p3)  ;;  %v1464_v5 = vld [vmem:[%s1861_s6 + $0xc] sm:$0xf] (!%p368_p3)  ;;  %v1467_v10 = vld [vmem:[%s1861_s6 + $0x10] sm:$0xf] (!%p368_p3) }
   0xc   : > { %1509 = vmatpush3.msk.msra.mxu1 (!%p368_p3), %vm531_vm0, %v524_v2  ;;  %1510 = vmatprep.mubr.msk.f32.mxu1 (!%p368_p3), %vm1633_vm1, %v1632_v1  ;;  %v1470_v12 = vld [vmem:[%s1861_s6 + $0x14] sm:$0xf] (!%p368_p3)  ;;  %v1473_v16 = vld [vmem:[%s1861_s6 + $0x18] sm:$0xf] (!%p368_p3)  ;;  %v1476_v20 = vld [vmem:[%s1861_s6 + $0x1c] sm:$0xf] (!%p368_p3) }
   0xd   : > { %1513 = vmatprep.subr.mxu0 (!%p368_p3), %v1632_v1  ;;  %1518 = vmatprep.subr.mxu1 (!%p368_p3), %v1632_v1  ;;  %v1479_v21 = vld [vmem:[%s1861_s6 + $0x20] sm:$0xf] (!%p368_p3) }
   0xe   : > { %v1482_v52 = vld [vmem:[%s1862_s7] ss:$0 sm:$0xff] (!%p368_p3) }
  0x10   : > { %s1878_s28 = smov (!%p452_p5, %s1618_s28), 1 }
  0x11   : > { %s455_s16 = scalar_select %p454_p6, %s1614_s27, 8 }
  0x12   : > { %s1864_s17 = smul.u32 9, %s1878_s28 }
  0x13   : > { %s1443_s18 = sshll.u32 %s455_s16, 1  ;;  %s1548_s19 = smul.u32 18, %s1878_s28 }
  0x14   : > { %s466_s20 = sadd.s32 %s1864_s17, %s455_s16  ;;  %s1866_s15 = smul.u32 9, %s1878_s28 }
  0x15   : > { %s1445_s22 = sshll.u32 %s466_s20, 3  ;;  %s458_s23 = sadd.s32 %s1548_s19, %s1443_s18 }
  0x16   : > { %s468_s26 = scalar_lea.vmem %s1856_s1, %s1445_s22  ;;  %s1444_s12 = sshll.u32 %s458_s23, 3 }
  0x17   : > { %v517_v4 = vld [vmem:[%s468_s26] sm:$0xff]  ;;  %s460_s17 = scalar_lea.vmem %s1855_s0, %s1444_s12  ;;  %s1452_s18 = sshll.u32 %s1878_s28, 3 }
  0x18   : > { %1506 = vmatmul.mubr.msk.f32.vlgmr.msra.gmra.mrb[0].mxu0 %vm527_vm2, %v517_v4  ;;  %v515_v6 = vld [vmem:[%s460_s17] sm:$0xff]  ;;  %v516_v7 = vld [vmem:[%s460_s17 + $0x8] sm:$0x1]  ;;  %s493_s22 = scalar_select %p492_p7, %s1614_s27, 7 }
  0x19   : > { %1511 = vmatmul.mubr.msk.f32.vlgmr.msra.gmra.mrb[0].mxu1 %vm527_vm2, %v515_v6  ;;  %v685_v8 = vrot.slane %v515_v6, 1  ;;  %v686_v9 = vrot.slane %v516_v7, 1  ;;  %1514 = vmatpush3.msk.msra.mxu0 %vm531_vm0, %v1461_v3  ;;  %s469_s23 = sadd.s32 1, %s1614_s27  ;;  %s1865_s27 = sshll.u32 %s1878_s28, 4 }
  0x1a   : > { %1519 = vmatpush3.msk.msra.mxu1 %vm531_vm0, %v1464_v5  ;;  %1515 = vmatprep.mubr.msk.f32.mxu0 %vm1633_vm1, %v1632_v1  ;;  %s1449_s17 = sshll.u32 %s493_s22, 1  ;;  %s1765_s25 = sadd.s32 %s1452_s18, %s493_s22 }
  0x1b   : > { %1523 = vmatprep.subr.mxu0 %v1632_v1  ;;  %v687_v11 = vsel %vm684_vm3, %v685_v8, %v686_v9  ;;  %1520 = vmatprep.mubr.msk.f32.mxu1 %vm1633_vm1, %v1632_v1  ;;  %s496_s26 = sadd.s32 %s1865_s27, %s1449_s17  ;;  %s1453_s12 = sshll.u32 %s1765_s25, 3 }
  0x1c   : > { %1516 = vmatmul.mubr.msk.f32.vlgmr.msra.gmra.mrb[2].mxu0 %vm527_vm2, %v687_v11  ;;  %s1451_s13 = sshll.u32 %s496_s26, 3  ;;  %1528 = vmatprep.subr.mxu1 %v1632_v1  ;;  %s506_s16 = scalar_lea.vmem %s1860_s5, %s1453_s12 }
  0x1d   : > { %1524 = vmatpush3.msk.msra.mxu0 %vm531_vm0, %v1467_v10  ;;  %s498_s22 = scalar_lea.vmem %s1859_s4, %s1451_s13  ;;  %1525 = vmatprep.mubr.msk.f32.mxu0 %vm1633_vm1, %v1632_v1  ;;  %v520_v13 = vld [vmem:[%s506_s16] sm:$0xff]  ;;  %p472_p8 = scmp.lt.s32.totalorder %s469_s23, 8 }
  0x1e   : > { %v518_v14 = vld [vmem:[%s498_s22] sm:$0xff]  ;;  %v519_v15 = vld [vmem:[%s498_s22 + $0x8] sm:$0x1]  ;;  %1533 = vmatprep.subr.mxu0 %v1632_v1 }
  0x1f   : > { %1521 = vmatmul.mubr.msk.f32.vlgmr.msra.gmra.mrb[2].mxu1 %vm527_vm2, %v518_v14  ;;  %v925_v17 = vrot.slane %v518_v14, 1  ;;  %v926_v18 = vrot.slane %v519_v15, 1  ;;  %s1880_s23 = smov (!%p472_p8, %s469_s23), 8 }
  0x20   : > { %1529 = vmatpush3.msk.msra.mxu1 %vm531_vm0, %v1470_v12  ;;  %1526 = vmatmul.mubr.msk.f32.vlgmr.msra.gmra.mrb[4].mxu0 %vm527_vm2, %v520_v13  ;;  %s1446_s14 = sshll.u32 %s1880_s23, 1  ;;  %s486_s16 = sadd.s32 %s1866_s15, %s1880_s23 }
  0x21   : > { %1530 = vmatprep.mubr.msk.f32.mxu1 %vm1633_vm1, %v1632_v1  ;;  %1534 = vmatpush3.msk.msra.mxu0 %vm531_vm0, %v1473_v16  ;;  %v927_v19 = vsel %vm684_vm3, %v925_v17, %v926_v18  ;;  %s476_s20 = sadd.s32 %s1548_s19, %s1446_s14  ;;  %s1448_s18 = sshll.u32 %s486_s16, 3 }
  0x22   : > { %1538 = vmatprep.subr.mxu1 %v1632_v1  ;;  %1535 = vmatprep.mubr.msk.f32.mxu0 %vm1633_vm1, %v1632_v1  ;;  %s1447_s22 = sshll.u32 %s476_s20, 3  ;;  %s488_s17 = scalar_lea.vmem %s1858_s3, %s1448_s18 }
  0x23   : > { %1531 = vmatmul.mubr.msk.f32.vlgmr.msra.gmra.mrb[4].mxu1 %vm527_vm2, %v927_v19  ;;  %1543 = vmatprep.subr.mxu0 %v1632_v1  ;;  %s478_s26 = scalar_lea.vmem %s1857_s2, %s1447_s22  ;;  %v523_v22 = vld [vmem:[%s488_s17] sm:$0xff]  ;;  %s514_s20 = scalar_lea.vmem %s1863_s8, %s1453_s12 }
  0x24   : > { %1539 = vmatpush3.msk.msra.mxu1 %vm531_vm0, %v1476_v20  ;;  %1540 = vmatprep.mubr.msk.f32.mxu1 %vm1633_vm1, %v1632_v1  ;;  %v521_v23 = vld [vmem:[%s478_s26] sm:$0xff]  ;;  %v522_v24 = vld [vmem:[%s478_s26 + $0x8] sm:$0x1] }
  0x25   : > { %1536 = vmatmul.mubr.msk.f32.vlgmr.msra.gmra.mrb[6].mxu0 %vm527_vm2, %v521_v23  ;;  %v1165_v25 = vrot.slane %v521_v23, 1  ;;  %v1166_v26 = vrot.slane %v522_v24, 1 }
  0x26   : > { %1544 = vmatpush3.msk.msra.mxu0 %vm531_vm0, %v1479_v21  ;;  %1545 = vmatprep.mubr.msk.f32.mxu0 %vm1633_vm1, %v1632_v1 }
  0x27   : > { %1541 = vmatmul.mubr.msk.f32.vlgmr.msra.gmra.mrb[6].mxu1 %vm527_vm2, %v523_v22  ;;  %v1167_v27 = vsel %vm684_vm3, %v1165_v25, %v1166_v26 }
  0x29   : > { %1546 = vmatmul.mubr.msk.f32.vlgmr.msra.gmra.mrb[8].mxu0 %vm527_vm2, %v1167_v27 }
  0xeb   : > { %v601_v28 = vpop.f32.mrb[0].mxu0 }
  0xec   : > { %v677_v29 = vpop.f32.mrb[0].mxu1  ;;  %v1507_v30 = vpop.f32.mrb[1].mxu0 }
  0xed   : > { %v678_v31 = vadd.f32 %v677_v29, %v601_v28  ;;  %v1512_v32 = vpop.f32.mrb[1].mxu1 }
  0xef   : > { %v759_v33 = vpop.f32.mrb[2].mxu0 }
  0xf0   : > { %v763_v34 = vadd.f32 %v759_v33, %v678_v31  ;;  %v1517_v35 = vpop.f32.mrb[3].mxu0 }
  0xf2   : > { %v838_v36 = vpop.f32.mrb[2].mxu1 }
  0xf3   : > { %v842_v37 = vadd.f32 %v838_v36, %v763_v34  ;;  %v1522_v38 = vpop.f32.mrb[3].mxu1  ;;  %v917_v39 = vpop.f32.mrb[4].mxu0 }
  0xf4   : > { %v1527_v40 = vpop.f32.mrb[5].mxu0 }
  0xf5   : > { %v921_v41 = vadd.f32 %v917_v39, %v842_v37 }
  0xf6   : > { %v999_v42 = vpop.f32.mrb[4].mxu1 }
  0xf7   : > { %v1003_v43 = vadd.f32 %v999_v42, %v921_v41  ;;  %v1532_v44 = vpop.f32.mrb[5].mxu1 }
  0xf8   : > { %v1078_v45 = vpop.f32.mrb[6].mxu0 }
  0xf9   : > { %v1082_v46 = vadd.f32 %v1078_v45, %v1003_v43  ;;  %v1537_v47 = vpop.f32.mrb[7].mxu0 }
  0xfa   : > { %v1157_v48 = vpop.f32.mrb[6].mxu1 }
  0xfb   : > { %v1542_v49 = vpop.f32.mrb[7].mxu1  ;;  %v1161_v50 = vadd.f32 %v1157_v48, %v1082_v46 }
  0xfc   : > { %v1239_v51 = vpop.f32.mrb[8].mxu0 }
  0xfd   : > { %v1243_v53 = vadd.f32 %v1239_v51, %v1161_v50  ;;  %v1547_v54 = vpop.f32.mrb[9].mxu0 }
  0xff   : > { %v1251_v55 = vadd.f32 %v1482_v52, %v1243_v53 }
 0x101   : > { %1252 = vst [vmem:[%s514_s20] sm:$0xff] %v1251_v55 }
 0x102 PF: > { %s18_s9 = sadd.s32 1, %s1630_s9   ;;  %s1867_s27 = smov %s1622_s29 }
 0x103   : > { %p15_p9 = scmp.ge.s32.totalorder %s18_s9, 18   ;;  %s1868_s28 = smov %s1626_s30 }
 0x104   : > { %s1869_s29 = smov %s1872_s10  ;;  %s1870_s30 = smov %s1876_s11 }
 0x105   :  { %17 = sbr.rel (!%p15_p9) target bundleno = 3 (0x3), region = 105 }

</bundles_post_ra>
